<compile_context>
chip_gen: v7x
topology: tpu7x:2x2x1
jax: 0.10.0
libtpu: 0.0.40
codegen_flags: <defaults>
</compile_context>

<pallas_src>
import functools

import numpy as np
import jax
import jax.numpy as jnp
from jax import lax
from jax.experimental import pallas as pl
from jax.experimental.pallas import tpu as pltpu

_PI = float(np.pi)
_LOFF = 128            # lane offset of the image inside the halo scratch


def _round_up(x, m):
    return -(-x // m) * m


# ---------------------------------------------------------------------------
# Kernel 1: KxK max-pool peak NMS + per-pixel channel max / argmax.
# grid = (B, C); channel axis accumulates into VMEM scratch.
# Runs on raw logits in the native dtype (sigmoid is monotonic, applied only
# to the per-pixel winner at the last channel).
# ---------------------------------------------------------------------------
def _heatmap_peak_kernel(hm_ref, score_ref, cls_ref, xs_ref, mw_ref, best_ref,
                         bidx_ref, *, pad, neg):
    c = pl.program_id(1)
    n_cls = pl.num_programs(1)
    p = pad
    H, W = hm_ref.shape[2], hm_ref.shape[3]
    Wp = best_ref.shape[1]                      # lane-dense width (mult of 128)
    dt = best_ref.dtype

    # Halo scratch: NEG border written once per image (c == 0).  The border
    # region is never overwritten by the interior store, so later channels of
    # the same image reuse it.
    @pl.when(c == 0)
    def _():
        xs_ref[...] = jnp.full(xs_ref.shape, neg, dt)
        mw_ref[0:p, :] = jnp.full((p, Wp), neg, dt)
        mw_ref[p + H:p + H + p, :] = jnp.full((p, Wp), neg, dt)

    # Place this channel's raw logits inside the halo (lane offset 128).
    xs_ref[p:p + H, _LOFF:_LOFF + W] = hm_ref[0, 0]

    # --- separable max pool, W direction: shifted ref loads (lane-dense) ----
    xw = xs_ref[p:p + H, _LOFF:_LOFF + Wp]      # centre window; pad lanes = NEG
    mw = xw
    for d in range(1, p + 1):
        mw = jnp.maximum(mw, xs_ref[p:p + H, _LOFF - d:_LOFF - d + Wp])
        mw = jnp.maximum(mw, xs_ref[p:p + H, _LOFF + d:_LOFF + d + Wp])

    # --- H direction: +/-d row windows read back from VMEM scratch ----------
    mw_ref[p:p + H, :] = mw
    mp = mw
    for d in range(1, p + 1):
        mp = jnp.maximum(mp, mw_ref[p - d:p - d + H, :])
        mp = jnp.maximum(mp, mw_ref[p + d:p + d + H, :])

    # Peak test on raw logits (sigmoid monotonic -> identical keep mask).
    sup = jnp.where(mp == xw, xw, jnp.full_like(xw, neg))

    # --- running channel max / argmax accumulated in VMEM scratch -----------
    @pl.when(c == 0)
    def _():
        best_ref[...] = sup
        bidx_ref[...] = jnp.zeros((H, Wp), jnp.int32)

    @pl.when(c > 0)
    def _():
        prev = best_ref[...]
        better = sup > prev                     # strict: first max wins ties
        best_ref[...] = jnp.where(better, sup, prev)
        bidx_ref[...] = jnp.where(better, c, bidx_ref[...])

    # --- finalize: sigmoid only on the winner; all-suppressed / pad lanes -> 0
    @pl.when(c == n_cls - 1)
    def _():
        bst = best_ref[...]
        score = jax.nn.sigmoid(bst.astype(jnp.float32))
        score_ref[0] = jnp.where(bst == neg, 0.0, score)
        cls_ref[0] = bidx_ref[...]


def heatmap_peaks(hm, pool_kernel=3):
    """Returns (score_map, class_map), each (B, H, Wp) with Wp = round_up(W, 128).

    Lanes >= W carry score 0 / class 0 and are sliced off by the caller.
    """
    B, C, H, W = hm.shape
    p = (pool_kernel - 1) // 2
    Wp = max(128, _round_up(W, 128))
    neg = float(jnp.finfo(hm.dtype).min)        # exact "suppressed" sentinel

    return pl.pallas_call(
        functools.partial(_heatmap_peak_kernel, pad=p, neg=neg),
        out_shape=(jax.ShapeDtypeStruct((B, H, Wp), jnp.float32),
                   jax.ShapeDtypeStruct((B, H, Wp), jnp.int32)),
        grid=(B, C),
        in_specs=[pl.BlockSpec((1, 1, H, W), lambda b, c: (b, c, 0, 0))],
        out_specs=(pl.BlockSpec((1, H, Wp), lambda b, c: (b, 0, 0)),
                   pl.BlockSpec((1, H, Wp), lambda b, c: (b, 0, 0))),
        scratch_shapes=[pltpu.VMEM((H + 2 * p, Wp + 2 * _LOFF), hm.dtype),
                        pltpu.VMEM((H + 2 * p, Wp), hm.dtype),
                        pltpu.VMEM((H, Wp), hm.dtype),
                        pltpu.VMEM((H, Wp), jnp.int32)],
        compiler_params=pltpu.CompilerParams(
            dimension_semantics=("parallel", "arbitrary")),
    )(hm)


# ---------------------------------------------------------------------------
# In-kernel atan / atan2 (Cephes atanf polynomial; f32-accurate) built from
# basic VPU ops so lowering never depends on a transcendental atan primitive.
# ---------------------------------------------------------------------------
def _atan(x):
    ax = jnp.abs(x)
    sgn = jnp.where(x < 0.0, -1.0, 1.0)
    t_hi = 2.414213562373095    # tan(3*pi/8)
    t_lo = 0.4142135623730951   # tan(pi/8)
    big = ax > t_hi
    mid = (ax > t_lo) & (~big)
    xr = jnp.where(big, -1.0 / jnp.maximum(ax, 1e-30),
                   jnp.where(mid, (ax - 1.0) / (ax + 1.0), ax))
    y0 = jnp.where(big, _PI / 2.0, jnp.where(mid, _PI / 4.0, 0.0))
    z = xr * xr
    poly = ((((8.05374449538e-2 * z - 1.38776856032e-1) * z
              + 1.99777106478e-1) * z - 3.33329491539e-1) * z * xr + xr)
    return sgn * (y0 + poly)


def _atan2(y, x):
    safe_x = jnp.where(x == 0.0, 1.0, x)
    base = _atan(y / safe_x)
    quad = jnp.where(x > 0.0, 0.0, jnp.where(y >= 0.0, _PI, -_PI))
    res = base + quad
    res = jnp.where(x == 0.0,
                    jnp.where(y > 0.0, _PI / 2.0,
                              jnp.where(y < 0.0, -_PI / 2.0, 0.0)),
                    res)
    return res


# ---------------------------------------------------------------------------
# Kernel 2: per-detection decode, single invocation, batch flattened on lanes.
# input rows : 0=u 1=v 2=w 3=h 4=dep_logit 5=rot_sin 6=rot_cos 7=dim_h
#              8..20 = per-image scalars broadcast on lanes
#              (m00 m01 m02 m10 m11 m12 fx fy cx cy tx ty tz), 21..23 = pad
# output rows: 0..3=bbox 4..5=center 6=dep 7..9=location 10=alpha 11=rot_y
# ---------------------------------------------------------------------------
def _decode_kernel(f_ref, o_ref, *, focal_length_default):
    f = f_ref[...]                                    # (24, N) f32
    u = f[0:1, :]
    v = f[1:2, :]
    w_half = f[2:3, :] * 0.5
    h_half = f[3:4, :] * 0.5
    dep_logit = f[4:5, :]
    rot_sin = f[5:6, :]
    rot_cos = f[6:7, :]
    dim_h = f[7:8, :]
    m00 = f[8:9, :]; m01 = f[9:10, :]; m02 = f[10:11, :]
    m10 = f[11:12, :]; m11 = f[12:13, :]; m12 = f[13:14, :]
    fx = f[14:15, :]; fy = f[15:16, :]
    cx = f[16:17, :]; cy = f[17:18, :]
    tx = f[18:19, :]; ty = f[19:20, :]; tz = f[20:21, :]

    def aff_x(px, py):
        return m00 * px + m01 * py + m02

    def aff_y(px, py):
        return m10 * px + m11 * py + m12

    x1 = u - w_half
    y1 = v - h_half
    x2 = u + w_half
    y2 = v + h_half
    ctx = aff_x(u, v)
    cty = aff_y(u, v)

    scaler = (fx + fy) * (0.5 / focal_length_default)
    dep = (1.0 / (jax.nn.sigmoid(dep_logit) + 1e-6) - 1.0) * scaler

    z = dep - tz
    lx = (ctx * dep - tx - cx * z) / fx
    ly = (cty * dep - ty - cy * z) / fy + dim_h * 0.5          # y += h / 2

    alpha = _atan2(rot_sin, rot_cos) - _PI / 2.0               # unwrapped (ref)
    roty = alpha + _atan2(lx, z)
    roty = jnp.where(roty > _PI, roty - 2.0 * _PI, roty)
    roty = jnp.where(roty < -_PI, roty + 2.0 * _PI, roty)

    # Lane-dense (16, N) output block; written back to HBM as one dense block.
    o_ref[0:1, :] = aff_x(x1, y1)
    o_ref[1:2, :] = aff_y(x1, y1)
    o_ref[2:3, :] = aff_x(x2, y2)
    o_ref[3:4, :] = aff_y(x2, y2)
    o_ref[4:5, :] = ctx
    o_ref[5:6, :] = cty
    o_ref[6:7, :] = dep
    o_ref[7:8, :] = lx
    o_ref[8:9, :] = ly
    o_ref[9:10, :] = z
    o_ref[10:11, :] = alpha
    o_ref[11:12, :] = roty
    o_ref[12:16, :] = jnp.zeros((4, u.shape[1]), jnp.float32)


def decode_topk(slab, focal_length_default):
    R, N = slab.shape
    return pl.pallas_call(
        functools.partial(_decode_kernel,
                          focal_length_default=float(focal_length_default)),
        out_shape=jax.ShapeDtypeStruct((16, N), jnp.float32),
        grid=(1,),
        in_specs=[pl.BlockSpec((R, N), lambda i: (0, 0))],
        out_specs=pl.BlockSpec((16, N), lambda i: (0, 0)),
    )(slab)


# ---------------------------------------------------------------------------
# Wrapper reproducing Real3DDecoder.forward (defaults, no NMS / undistort / gt)
# ---------------------------------------------------------------------------
def real3d_decoder_forward(pred, calib, ori_img_shape, *, focal_length_default,
                           topk, max_pooling_kernel_size=3):
    hm = pred["hm"]
    B, C, H, W = hm.shape

    score_map, class_map = heatmap_peaks(hm, max_pooling_kernel_size)
    scores_all = score_map[:, :, :W].reshape(B, H * W)
    classes_all = class_map[:, :, :W].reshape(B, H * W)

    scores, topk_idx = lax.top_k(scores_all, topk)
    category_id = jnp.take_along_axis(classes_all, topk_idx, axis=1)

    # top-k padded onto a 128-lane axis; gather each head separately in its
    # native dtype (no full-size (B, 8, H*W) concat / upcast round trip).
    Np = max(128, _round_up(topk, 128))
    idx_pad = jnp.pad(topk_idx, ((0, 0), (0, Np - topk)))

    def gather_head(m):
        c = m.shape[1]
        return jnp.take_along_axis(m.reshape(B, c, H * W),
                                   idx_pad[:, None, :], axis=2)

    wh_g = gather_head(pred["wh"])                               # (B, 2, Np)
    dep_g = gather_head(pred["dep"])                             # (B, 1, Np)
    rot_g = gather_head(pred["rot"])                             # (B, 2, Np)
    dim_g = gather_head(pred["dim"]).astype(jnp.float32)         # (B, 3, Np)

    u = (idx_pad % W).astype(jnp.float32)
    v = (idx_pad // W).astype(jnp.float32)

    feat = jnp.concatenate(
        [u[:, None, :], v[:, None, :],
         wh_g.astype(jnp.float32), dep_g.astype(jnp.float32),
         rot_g.astype(jnp.float32), dim_g[:, 0:1, :]], axis=1)   # (B, 8, Np)

    # TODO(synk): `get_affine_transform` is an external helper not included in
    # the module source; use a plain per-image rescale affine (rotation=0,
    # center_shift=(0,0), pre_resize_scale=-1) mapping feature -> original px.
    ori_h = ori_img_shape[:, 0].astype(jnp.float32)
    ori_w = ori_img_shape[:, 1].astype(jnp.float32)
    zeros = jnp.zeros_like(ori_w)
    calib = calib.astype(jnp.float32)
    scal = jnp.stack([ori_w / W, zeros, zeros,
                      zeros, ori_h / H, zeros,
                      calib[:, 0, 0], calib[:, 1, 1],
                      calib[:, 0, 2], calib[:, 1, 2],
                      calib[:, 0, 3], calib[:, 1, 3],
                      calib[:, 2, 3]], axis=-1)                  # (B, 13)
    scal_rows = jnp.broadcast_to(scal[:, :, None], (B, 13, Np))

    slab = jnp.concatenate(
        [feat, scal_rows, jnp.zeros((B, 3, Np), jnp.float32)], axis=1)
    slab = slab.transpose(1, 0, 2).reshape(24, B * Np)           # (24, B*Np)

    dec = decode_topk(slab, focal_length_default)                # (16, B*Np)
    dec = dec.reshape(16, B, Np)[:, :, :topk]                    # (16, B, topk)

    return {
        "category_id": category_id,
        "score": scores,
        "dim": dim_g[:, :, :topk].transpose(0, 2, 1),
        "bbox": dec[0:4].transpose(1, 2, 0),
        "center": dec[4:6].transpose(1, 2, 0),
        "dep": dec[6],
        "location": dec[7:10].transpose(1, 2, 0),
        "alpha": dec[10],
        "rotation_y": dec[11],
    }


# ---------------------------------------------------------------------------
# Pure-JAX reference (for correctness checking only)
# ---------------------------------------------------------------------------
def reference_forward(pred, calib, ori_img_shape, *, focal_length_default,
                      topk, max_pooling_kernel_size=3):
    hm = jax.nn.sigmoid(pred["hm"].astype(jnp.float32))
    B, C, H, W = hm.shape
    k = max_pooling_kernel_size
    pad = (k - 1) // 2
    maxp = lax.reduce_window(hm, -jnp.inf, lax.max, (1, 1, k, k), (1, 1, 1, 1),
                             [(0, 0), (0, 0), (pad, pad), (pad, pad)])
    hm_sup = hm * (maxp == hm).astype(hm.dtype)
    flat = hm_sup.transpose(0, 2, 3, 1).reshape(B, H * W, C)
    scores_all = flat.max(axis=-1)
    classes_all = jnp.argmax(flat, axis=-1).astype(jnp.int32)
    scores, idx = lax.top_k(scores_all, topk)
    category_id = jnp.take_along_axis(classes_all, idx, axis=1)

    def gather(m):
        c = m.shape[1]
        f = m.transpose(0, 2, 3, 1).reshape(B, H * W, c)
        return jnp.take_along_axis(f, idx[:, :, None], axis=1).astype(jnp.float32)

    wh = gather(pred["wh"]); dep = gather(pred["dep"])
    rot = gather(pred["rot"]); dim3 = gather(pred["dim"])

    u = (idx % W).astype(jnp.float32)
    v = (idx // W).astype(jnp.float32)
    center = jnp.stack([u, v], axis=-1)

    ori_h = ori_img_shape[:, 0].astype(jnp.float32)
    ori_w = ori_img_shape[:, 1].astype(jnp.float32)
    sx = (ori_w / W)[:, None]
    sy = (ori_h / H)[:, None]

    def aff(pt):
        return jnp.stack([pt[..., 0] * sx, pt[..., 1] * sy], axis=-1)

    bbox = jnp.concatenate([aff(center - wh / 2), aff(center + wh / 2)], axis=-1)
    center_t = aff(center)

    calib = calib.astype(jnp.float32)
    dep = 1.0 / (jax.nn.sigmoid(dep) + 1e-6) - 1.0
    scaler = ((calib[:, 0, 0] + calib[:, 1, 1]) / 2.0
              / focal_length_default)[:, None, None]
    dep = dep * scaler
    z = dep - calib[:, 2, 3][:, None, None]
    cx = calib[:, 0, 2][:, None, None]; cy = calib[:, 1, 2][:, None, None]
    fx = calib[:, 0, 0][:, None, None]; fy = calib[:, 1, 1][:, None, None]
    tx = calib[:, 0, 3][:, None, None]; ty = calib[:, 1, 3][:, None, None]
    x = (center_t[:, :, 0:1] * dep - tx - cx * z) / fx
    y = (center_t[:, :, 1:2] * dep - ty - cy * z) / fy
    loc = jnp.concatenate([x, y, z], axis=-1)
    loc = loc.at[:, :, 1].add(dim3[:, :, 0] / 2.0)
    alpha = jnp.arctan2(rot[:, :, 0], rot[:, :, 1]) - np.pi / 2.0
    rot_y = alpha + jnp.arctan2(loc[:, :, 0], loc[:, :, 2])
    rot_y = jnp.where(rot_y > np.pi, rot_y - 2 * np.pi, rot_y)
    rot_y = jnp.where(rot_y < -np.pi, rot_y + 2 * np.pi, rot_y)
    return {"category_id": category_id, "score": scores, "dim": dim3,
            "bbox": bbox, "center": center_t, "dep": dep[..., 0],
            "location": loc, "alpha": alpha, "rotation_y": rot_y}


if __name__ == "__main__":
    key = jax.random.PRNGKey(0)
    B, C, H, W = 2, 4, 16, 16
    topk = 8
    focal_length_default = 721.5377

    ks = jax.random.split(key, 5)
    pred = {
        "hm":  2.0 * jax.random.normal(ks[0], (B, C, H, W), jnp.float32),
        "wh":  4.0 * jax.random.normal(ks[1], (B, 2, H, W), jnp.float32) + 8.0,
        "dep": jax.random.normal(ks[2], (B, 1, H, W), jnp.float32),
        "rot": jax.random.normal(ks[3], (B, 2, H, W), jnp.float32),
        "dim": jax.random.normal(ks[4], (B, 3, H, W), jnp.float32) + 1.5,
    }

    fx = jnp.array([750.0, 760.0]); fy = jnp.array([745.0, 755.0])
    cxp = jnp.array([80.0, 96.0]);  cyp = jnp.array([64.0, 72.0])
    tx = jnp.array([0.5, -0.3]);    ty = jnp.array([-0.2, 0.1])
    tz = jnp.array([0.01, -0.02])
    calib = jnp.zeros((B, 3, 4), jnp.float32)
    calib = calib.at[:, 0, 0].set(fx).at[:, 1, 1].set(fy)
    calib = calib.at[:, 0, 2].set(cxp).at[:, 1, 2].set(cyp)
    calib = calib.at[:, 0, 3].set(tx).at[:, 1, 3].set(ty)
    calib = calib.at[:, 2, 2].set(1.0).at[:, 2, 3].set(tz)

    ori_img_shape = jnp.array([[128, 160], [144, 192]], jnp.int32)  # (h, w)

    out = real3d_decoder_forward(
        pred, calib, ori_img_shape,
        focal_length_default=focal_length_default,
        topk=topk, max_pooling_kernel_size=3)
    out = jax.tree_util.tree_map(jax.block_until_ready, out)

    ref = reference_forward(
        pred, calib, ori_img_shape,
        focal_length_default=focal_length_default,
        topk=topk, max_pooling_kernel_size=3)

    for name in sorted(out):
        np.testing.assert_allclose(np.asarray(out[name]), np.asarray(ref[name]),
                                   rtol=2e-3, atol=2e-3,
                                   err_msg=f"mismatch in '{name}'")

    print("KERNEL_OK")
</pallas_src>

<mosaic_0001>
module attributes {stable_mosaic.version = 11 : i64} {
  func.func @_heatmap_peak_kernel(%arg0: i32, %arg1: i32, %arg2: memref<1x1x16x16xf32, #tpu.memory_space<vmem>>, %arg3: memref<1x16x128xf32, #tpu.memory_space<vmem>>, %arg4: memref<1x16x128xi32, #tpu.memory_space<vmem>>, %arg5: memref<18x384xf32, #tpu.memory_space<vmem>>, %arg6: memref<18x128xf32, #tpu.memory_space<vmem>>, %arg7: memref<16x128xf32, #tpu.memory_space<vmem>>, %arg8: memref<16x128xi32, #tpu.memory_space<vmem>>) attributes {dimension_semantics = [#tpu.dimension_semantics<parallel>, #tpu.dimension_semantics<arbitrary>], iteration_bounds = array<i64: 2, 4>, scalar_prefetch = 0 : i64, scratch_operands = 4 : i64, tpu.core_type = #tpu.core_type<tc>, window_params = [{transform_indices = @transform_0, window_bounds = array<i64: 1, 1, 16, 16>}, {transform_indices = @transform_1, window_bounds = array<i64: 1, 16, 128>}, {transform_indices = @transform_2, window_bounds = array<i64: 1, 16, 128>}]} {
    %c0_i32 = arith.constant 0 : i32
    %0 = arith.cmpi eq, %arg1, %c0_i32 : i32
    %1 = arith.extui %0 : i1 to i32
    %c0_i32_0 = arith.constant 0 : i32
    %2 = arith.cmpi ne, %1, %c0_i32_0 : i32
    scf.if %2 {
      %cst_18 = arith.constant -3.40282347E+38 : f32
      %28 = vector.broadcast %cst_18 : f32 to vector<18x384xf32>
      %c0_19 = arith.constant 0 : index
      %c0_20 = arith.constant 0 : index
      %29 = vector.load %arg5[%c0_19, %c0_20] : memref<18x384xf32, #tpu.memory_space<vmem>>, vector<18x384xf32>
      tpu.vector_store %arg5[%c0_19, %c0_20], %28 {strides = array<i32>} : memref<18x384xf32, #tpu.memory_space<vmem>>, vector<18x384xf32>,
      %cst_21 = arith.constant -3.40282347E+38 : f32
      %30 = vector.broadcast %cst_21 : f32 to vector<1x128xf32>
      %c0_22 = arith.constant 0 : index
      %c0_23 = arith.constant 0 : index
      %31 = vector.load %arg6[%c0_22, %c0_23] : memref<18x128xf32, #tpu.memory_space<vmem>>, vector<1x128xf32>
      tpu.vector_store %arg6[%c0_22, %c0_23], %30 {strides = array<i32>} : memref<18x128xf32, #tpu.memory_space<vmem>>, vector<1x128xf32>,
      %cst_24 = arith.constant -3.40282347E+38 : f32
      %32 = vector.broadcast %cst_24 : f32 to vector<1x128xf32>
      %c17 = arith.constant 17 : index
      %c0_25 = arith.constant 0 : index
      %33 = vector.load %arg6[%c17, %c0_25] : memref<18x128xf32, #tpu.memory_space<vmem>>, vector<1x128xf32>
      tpu.vector_store %arg6[%c17, %c0_25], %32 {strides = array<i32>} : memref<18x128xf32, #tpu.memory_space<vmem>>, vector<1x128xf32>,
    } else {
    }
    %c0 = arith.constant 0 : index
    %c0_1 = arith.constant 0 : index
    %c0_2 = arith.constant 0 : index
    %c0_3 = arith.constant 0 : index
    %3 = vector.load %arg2[%c0, %c0_1, %c0_2, %c0_3] : memref<1x1x16x16xf32, #tpu.memory_space<vmem>>, vector<1x1x16x16xf32>
    %4 = vector.shape_cast %3 : vector<1x1x16x16xf32> to vector<16x16xf32>
    %c1 = arith.constant 1 : index
    %c128 = arith.constant 128 : index
    %5 = vector.load %arg5[%c1, %c128] : memref<18x384xf32, #tpu.memory_space<vmem>>, vector<16x16xf32>
    tpu.vector_store %arg5[%c1, %c128], %4 {strides = array<i32>} : memref<18x384xf32, #tpu.memory_space<vmem>>, vector<16x16xf32>,
    %c1_4 = arith.constant 1 : index
    %c128_5 = arith.constant 128 : index
    %6 = vector.load %arg5[%c1_4, %c128_5] : memref<18x384xf32, #tpu.memory_space<vmem>>, vector<16x128xf32>
    %c1_6 = arith.constant 1 : index
    %c127 = arith.constant 127 : index
    %7 = vector.load %arg5[%c1_6, %c127] : memref<18x384xf32, #tpu.memory_space<vmem>>, vector<16x128xf32>
    %8 = arith.maximumf %6, %7 : vector<16x128xf32>
    %c1_7 = arith.constant 1 : index
    %c129 = arith.constant 129 : index
    %9 = vector.load %arg5[%c1_7, %c129] : memref<18x384xf32, #tpu.memory_space<vmem>>, vector<16x128xf32>
    %10 = arith.maximumf %8, %9 : vector<16x128xf32>
    %c1_8 = arith.constant 1 : index
    %c0_9 = arith.constant 0 : index
    %11 = vector.load %arg6[%c1_8, %c0_9] : memref<18x128xf32, #tpu.memory_space<vmem>>, vector<16x128xf32>
    tpu.vector_store %arg6[%c1_8, %c0_9], %10 {strides = array<i32>} : memref<18x128xf32, #tpu.memory_space<vmem>>, vector<16x128xf32>,
    %c0_10 = arith.constant 0 : index
    %c0_11 = arith.constant 0 : index
    %12 = vector.load %arg6[%c0_10, %c0_11] : memref<18x128xf32, #tpu.memory_space<vmem>>, vector<16x128xf32>
    %13 = arith.maximumf %10, %12 : vector<16x128xf32>
    %c2 = arith.constant 2 : index
    %c0_12 = arith.constant 0 : index
    %14 = vector.load %arg6[%c2, %c0_12] : memref<18x128xf32, #tpu.memory_space<vmem>>, vector<16x128xf32>
    %15 = arith.maximumf %13, %14 : vector<16x128xf32>
    %16 = arith.cmpf oeq, %15, %6 : vector<16x128xf32>
    %cst = arith.constant -3.40282347E+38 : f32
    %17 = vector.broadcast %cst : f32 to vector<16x128xf32>
    %18 = arith.select %16, %6, %17 : vector<16x128xi1>, vector<16x128xf32>
    %c0_i32_13 = arith.constant 0 : i32
    %19 = arith.cmpi eq, %arg1, %c0_i32_13 : i32
    %20 = arith.extui %19 : i1 to i32
    %c0_i32_14 = arith.constant 0 : i32
    %21 = arith.cmpi ne, %20, %c0_i32_14 : i32
    scf.if %21 {
      %c0_18 = arith.constant 0 : index
      %c0_19 = arith.constant 0 : index
      %28 = vector.load %arg7[%c0_18, %c0_19] : memref<16x128xf32, #tpu.memory_space<vmem>>, vector<16x128xf32>
      tpu.vector_store %arg7[%c0_18, %c0_19], %18 {strides = array<i32>} : memref<16x128xf32, #tpu.memory_space<vmem>>, vector<16x128xf32>,
      %c0_i32_20 = arith.constant 0 : i32
      %29 = vector.broadcast %c0_i32_20 : i32 to vector<16x128xi32>
      %c0_21 = arith.constant 0 : index
      %c0_22 = arith.constant 0 : index
      %30 = vector.load %arg8[%c0_21, %c0_22] : memref<16x128xi32, #tpu.memory_space<vmem>>, vector<16x128xi32>
      tpu.vector_store %arg8[%c0_21, %c0_22], %29 {strides = array<i32>} : memref<16x128xi32, #tpu.memory_space<vmem>>, vector<16x128xi32>,
    } else {
    }
    %c0_i32_15 = arith.constant 0 : i32
    %22 = arith.cmpi sgt, %arg1, %c0_i32_15 : i32
    %23 = arith.extui %22 : i1 to i32
    %c0_i32_16 = arith.constant 0 : i32
    %24 = arith.cmpi ne, %23, %c0_i32_16 : i32
    scf.if %24 {
      %c0_18 = arith.constant 0 : index
      %c0_19 = arith.constant 0 : index
      %28 = vector.load %arg7[%c0_18, %c0_19] : memref<16x128xf32, #tpu.memory_space<vmem>>, vector<16x128xf32>
      %29 = arith.cmpf ogt, %18, %28 : vector<16x128xf32>
      %30 = arith.select %29, %18, %28 : vector<16x128xi1>, vector<16x128xf32>
      %c0_20 = arith.constant 0 : index
      %c0_21 = arith.constant 0 : index
      %31 = vector.load %arg7[%c0_20, %c0_21] : memref<16x128xf32, #tpu.memory_space<vmem>>, vector<16x128xf32>
      tpu.vector_store %arg7[%c0_20, %c0_21], %30 {strides = array<i32>} : memref<16x128xf32, #tpu.memory_space<vmem>>, vector<16x128xf32>,
      %c0_22 = arith.constant 0 : index
      %c0_23 = arith.constant 0 : index
      %32 = vector.load %arg8[%c0_22, %c0_23] : memref<16x128xi32, #tpu.memory_space<vmem>>, vector<16x128xi32>
      %33 = vector.broadcast %arg1 : i32 to vector<16x128xi32>
      %34 = arith.select %29, %33, %32 : vector<16x128xi1>, vector<16x128xi32>
      %c0_24 = arith.constant 0 : index
      %c0_25 = arith.constant 0 : index
      %35 = vector.load %arg8[%c0_24, %c0_25] : memref<16x128xi32, #tpu.memory_space<vmem>>, vector<16x128xi32>
      tpu.vector_store %arg8[%c0_24, %c0_25], %34 {strides = array<i32>} : memref<16x128xi32, #tpu.memory_space<vmem>>, vector<16x128xi32>,
    } else {
    }
    %c3_i32 = arith.constant 3 : i32
    %25 = arith.cmpi eq, %arg1, %c3_i32 : i32
    %26 = arith.extui %25 : i1 to i32
    %c0_i32_17 = arith.constant 0 : i32
    %27 = arith.cmpi ne, %26, %c0_i32_17 : i32
    scf.if %27 {
      %c0_18 = arith.constant 0 : index
      %c0_19 = arith.constant 0 : index
      %28 = vector.load %arg7[%c0_18, %c0_19] : memref<16x128xf32, #tpu.memory_space<vmem>>, vector<16x128xf32>
      %29 = arith.negf %28 : vector<16x128xf32>
      %30 = math.exp %29 : vector<16x128xf32>
      %cst_20 = arith.constant 1.000000e+00 : f32
      %31 = vector.broadcast %cst_20 : f32 to vector<16x128xf32>
      %32 = arith.addf %31, %30 : vector<16x128xf32>
      %33 = arith.divf %31, %32 : vector<16x128xf32>
      %cst_21 = arith.constant -3.40282347E+38 : f32
      %34 = vector.broadcast %cst_21 : f32 to vector<16x128xf32>
      %35 = arith.cmpf oeq, %28, %34 : vector<16x128xf32>
      %cst_22 = arith.constant 0.000000e+00 : f32
      %36 = vector.broadcast %cst_22 : f32 to vector<16x128xf32>
      %37 = arith.select %35, %36, %33 : vector<16x128xi1>, vector<16x128xf32>
      %c0_23 = arith.constant 0 : index
      %c0_24 = arith.constant 0 : index
      %c0_25 = arith.constant 0 : index
      %38 = vector.load %arg3[%c0_23, %c0_24, %c0_25] : memref<1x16x128xf32, #tpu.memory_space<vmem>>, vector<1x16x128xf32>
      %39 = vector.shape_cast %38 : vector<1x16x128xf32> to vector<16x128xf32>
      %40 = vector.shape_cast %37 : vector<16x128xf32> to vector<1x16x128xf32>
      tpu.vector_store %arg3[%c0_23, %c0_24, %c0_25], %40 {strides = array<i32>} : memref<1x16x128xf32, #tpu.memory_space<vmem>>, vector<1x16x128xf32>,
      %c0_26 = arith.constant 0 : index
      %c0_27 = arith.constant 0 : index
      %41 = vector.load %arg8[%c0_26, %c0_27] : memref<16x128xi32, #tpu.memory_space<vmem>>, vector<16x128xi32>
      %c0_28 = arith.constant 0 : index
      %c0_29 = arith.constant 0 : index
      %c0_30 = arith.constant 0 : index
      %42 = vector.load %arg4[%c0_28, %c0_29, %c0_30] : memref<1x16x128xi32, #tpu.memory_space<vmem>>, vector<1x16x128xi32>
      %43 = vector.shape_cast %42 : vector<1x16x128xi32> to vector<16x128xi32>
      %44 = vector.shape_cast %41 : vector<16x128xi32> to vector<1x16x128xi32>
      tpu.vector_store %arg4[%c0_28, %c0_29, %c0_30], %44 {strides = array<i32>} : memref<1x16x128xi32, #tpu.memory_space<vmem>>, vector<1x16x128xi32>,
    } else {
    }
    return
  }
  func.func @transform_0(%arg0: i32, %arg1: i32) -> (i32, i32, i32, i32) {
    %c0_i32 = arith.constant 0 : i32
    %c0_i32_0 = arith.constant 0 : i32
    %c0_i32_1 = arith.constant 0 : i32
    return %arg0, %arg1, %c0_i32, %c0_i32_0 : i32, i32, i32, i32
  }
  func.func @transform_1(%arg0: i32, %arg1: i32) -> (i32, i32, i32) {
    %c0_i32 = arith.constant 0 : i32
    %c0_i32_0 = arith.constant 0 : i32
    %c0_i32_1 = arith.constant 0 : i32
    return %arg0, %c0_i32, %c0_i32_0 : i32, i32, i32
  }
  func.func @transform_2(%arg0: i32, %arg1: i32) -> (i32, i32, i32) {
    %c0_i32 = arith.constant 0 : i32
    %c0_i32_0 = arith.constant 0 : i32
    %c0_i32_1 = arith.constant 0 : i32
    return %arg0, %c0_i32, %c0_i32_0 : i32, i32, i32
  }
}

</mosaic_0001>

<bundles_post_ra>
// kernel: tpu_custom_call.1
= control target key start
LH: loop header
LB: loop body
LE: loop exit
PB: predicated region body
PF: predicated region fallthrough
CT: control target
= control target key end

     0   :  { %8 = vsyncpa [#allocation7], 0  ;;  %s1209_s0 = inlined_call_operand.hbm [shape: f32[2,4,16,16], index: 0, kind: input, shape index: {}]   ;;  %s1210_s1 = inlined_call_operand.hbm [shape: f32[2,16,128], index: 1, kind: output, shape index: {0}]   ;;  %s1211_s2 = inlined_call_operand.hbm [shape: s32[2,16,128], index: 2, kind: output, shape index: {1}]  }
   0x1   :  { %10 = vsyncpa [#allocation7 + $0x1], 0 }
   0x2   :  { %11 = vsyncpa [#allocation8], 0 }
   0x3   :  { %13 = vsyncpa [#allocation8 + $0x1], 0 }
   0x4   :  { %14 = vsyncpa [#allocation11], 0 }
   0x5   :  { %16 = vsyncpa [#allocation11 + $0x1], 0  ;;  %s906_s9 = smov 0   ;;  %s908_s10 = smov 0  }
   0x6   :  { %s910_s11 = smov 0   ;;  %s912_s12 = smov 0  }
   0x7   :  { %s914_s13 = smov 0   ;;  %s916_s14 = smov 0  }
   0x8   :  { %s918_s15 = smov 0   ;;  %s920_s16 = smov 0  }
   0x9   :  { %s922_s17 = smov 0   ;;  %s924_s18 = smov 0  }
   0xa   :  { %s926_s19 = smov 0  }
   0xb LB: > { %s543_s20 = sadd.s32 4294967295, %s878_s19   ;;  %s544_s21 = sadd.s32 4294967294, %s878_s19   ;;  %s878_s19 = sphi %s926_s19, %s22_s19   ;;  %s874_s18 = sphi %s924_s18, %s1235_s18   ;;  %s870_s17 = sphi %s922_s17, %s1234_s17   ;;  %s866_s16 = sphi %s920_s16, %s1233_s16   ;;  %s862_s15 = sphi %s918_s15, %s1232_s15   ;;  %s858_s14 = sphi %s916_s14, %s1231_s14   ;;  %s854_s13 = sphi %s914_s13, %s1230_s13   ;;  %s850_s12 = sphi %s912_s12, %s1229_s12   ;;  %s846_s11 = sphi %s910_s11, %s1228_s11   ;;  %s842_s10 = sphi %s908_s10, %s1227_s10   ;;  %s838_s9 = sphi %s906_s9, %s1226_s9  }
   0xc   : > { %s31_s22 = sadd.s32 1, %s870_s17  ;;  %s34_s23 = sadd.s32 1, %s874_s18 }
   0xd   : > { %p32_p0 = scmp.ge.s32.totalorder %s31_s22, 4  ;;  %s43_s24 = sadd.s32 1, %s858_s14 }
   0xe   : > { %p50_p1 = scmp.ne.s32.totalorder %s858_s14, %s854_s13  ;;  %p51_p2 = scmp.eq.s32.totalorder %s878_s19, 0 }
   0xf   : > { %s1237_s22 = smov (%p32_p0, %s31_s22), 0  ;;  %s1239_s23 = smov (!%p32_p0, %s34_s23), %s874_s18 }
  0x10   : > { %1215 = sst [smem:[#allocation15_spill]] %s1237_s22  ;;  %s39_s25 = ssub.s32 %s870_s17, %s1237_s22 }
  0x11   : > { %p972_p3 = por %p51_p2, %p50_p1  ;;  %p36_p4 = scmp.ge.s32.totalorder %s1239_s23, 2 }
  0x12   : > { %p56_p5 = scmp.ne.s32.totalorder %s854_s13, %s850_s12  ;;  %p57_p6 = scmp.eq.s32.totalorder %s543_s20, 0 }
  0x13   : > { %s69_s27 = sadd.s32 1, %s846_s11  ;;  %s1241_s23 = smov (%p36_p4, %s1239_s23), 0 }
  0x14   : > { %1217 = sst [smem:[#allocation16_spill]] %s1241_s23  ;;  %p980_p7 = por %p57_p6, %p56_p5 }
  0x15   : > { %p79_p8 = scmp.ne.s32.totalorder %s846_s11, %s842_s10  ;;  %s38_s29 = ssub.s32 %s874_s18, %s1241_s23 }
  0x16   : > { %p80_p9 = scmp.eq.s32.totalorder %s543_s20, 7  ;;  %s40_s30 = sor.u32 %s39_s25, %s38_s29 }
  0x17   : > { %p67_p10 = scmp.eq.s32.totalorder %s38_s29, 0  ;;  %p41_p11 = scmp.eq.s32.totalorder %s40_s30, 0 }
  0x18   : > { %p988_p12 = por %p80_p9, %p79_p8  ;;  %p85_p13 = scmp.ne.s32.totalorder %s842_s10, %s838_s9 }
  0x19   : > { %s993_s4 = scalar_select %p67_p10, %s846_s11, %s69_s27  }
  0x1a   : > { %s1219_s3 = scalar_select %p988_p12, 1, 0 }
  0x1b   : > { %s996_s5 = scalar_select %p41_p11, %s858_s14, %s43_s24  }
  0x1c   : > { %p86_p0 = scmp.eq.s32.totalorder %s544_s21, 7  ;;  %p588_p1 = scmp.lt.s32.totalorder %s878_s19, 8 }
  0x1d   : > { %s132_s7 = sand.u32 1, %s858_s14   ;;  %s548_s12 = sshll.u32 %s870_s17, 1 }
  0x1e   : > { %p1001_p2 = por %p86_p0, %p85_p13  ;;  %s547_s8 = sshll.u32 %s132_s7, 4 }
  0x1f   : > { %s549_s20 = sshll.u32 %s874_s18, 3  ;;  %s136_s25 = scalar_lea.vmem [#allocation6], %s547_s8 }
  0x20   : > { %s1220_s6 = scalar_select %p1001_p2, 1, 0 }
  0x21   : > { %s145_s29 = sshll.u32 %s136_s25, 4  ;;  %s142_s30 = sadd.s32 %s549_s20, %s548_s12  ;;  %s1008_s29 = int_to_ptr.vmem [resolvable:$true] %s145_s29 }
  0x22   : > { %s550_s27 = sshll.u32 %s142_s30, 7  ;;  %p1012_p4 = pnand %p588_p1, %p972_p3 }
  0x23   : > { %s1019_s22 = scalar_lea.hbm %s1209_s0, %s550_s27  ;;  %s1021_s8 = scalar_lea.sflag [#allocation7], %s132_s7 }
  0x24   : > { %s694_s12 = scalar_lea.hbm %s1019_s22, 256  ;;  %p696_p3 = pneg %p1012_p4 }
  0x25   : > { %p695_p5 = scmp.ne.s32.totalorder %s1019_s22, %s694_s12  ;;  %s699_s20 = scalar_lea.hbm %s1209_s0, 2048 }
  0x26   : > { %p700_p9 = scmp.lt.u32.totalorder %s1019_s22, %s1209_s0  ;;  %p701_p10 = scmp.lt.u32.totalorder %s699_s20, %s694_s12 }
  0x27   : > { %p697_p6 = pnand %p696_p3, %p695_p5  ;;  %p703_p13 = scmp.lt.u32.totalorder %s694_s12, %s1019_s22 }
  0x28   : > { %p702_p11 = por %p701_p10, %p700_p9 }
  0x29   : > { %p698_p8 = pneg %p697_p6 }
  0x2a   : > { %p704_p0 = por %p703_p13, %p702_p11 }
  0x2c   : > { %p705_p1 = pnand %p704_p0, %p698_p8 }
  0x2e   : > { %708 = shalt.err (!%p705_p1)
}
  0x2f   : > { %s709_s7 = scalar_lea.vmem %s1008_s29, 256  ;;  %s880_s27 = smov [#allocation6]  }
  0x30   : > { %p710_p5 = scmp.ne.s32.totalorder %s1008_s29, %s709_s7  ;;  %s714_s21 = sshll.u32 %s880_s27, 4  ;;  %s715_s21 = int_to_ptr.vmem [resolvable:$false] %s714_s21 }
  0x31   : > { %s716_s26 = scalar_lea.vmem %s715_s21, 512  ;;  %p717_p12 = scmp.lt.s32.totalorder %s1008_s29, %s715_s21 }
  0x32   : > { %p712_p6 = pnand %p710_p5, %p696_p3  ;;  %p718_p9 = scmp.lt.s32.totalorder %s716_s26, %s709_s7 }
  0x34   : > { %p713_p2 = pneg %p712_p6  ;;  %p719_p10 = por %p718_p9, %p717_p12 }
  0x36   : > { %p720_p11 = pnand %p719_p10, %p713_p2 }
  0x38   : > { %723 = shalt.err (!%p720_p11)
}
  0x39   : > { %s881_s12 = smov 128   ;;  %s882_s23 = smov 8  }
  0x3a   : > { %580 = dma.hbm_to_vmem [thread:$0]  (!%p1012_p4), %s1019_s22, 256, %s1008_s29, %s1021_s8, %s881_s12, %s881_s12, %s882_s23  }
  0x3b   : > { %p551_p3 = scmp.ge.s32.totalorder %s878_s19, 1  ;;  %p153_p8 = scmp.lt.s32.totalorder %s878_s19, 9 }
  0x3d   : > { %p154_p13 = pnand %p551_p3, %p153_p8 }
  0x3e   : > { %s159_s20 = sand.u32 (!%p154_p13), 1, %s854_s13  }
  0x3f   : > { %157 = sbr.rel (%p154_p13) target bundleno = 342 (0x156), region = 24  ;;  %s1052_s25 = sshll.u32 (!%p154_p13), %s159_s20, 4 }
  0x40   : > { %s160_s30 = scalar_lea.sflag (!%p154_p13), [#allocation7], %s159_s20  ;;  %s163_s7 = scalar_lea.vmem (!%p154_p13), [#allocation6], %s1052_s25 }
  0x46   : > { %825 = dma.done.wait (%p980_p7), %s160_s30, 256  }
  0x47   : > { %827 = vsyncadd (%p980_p7), %s160_s30, 4294967040  ;;  %s1060_s24 = sand.u32 1, %s842_s10   ;;  %p555_p12 = scmp.ne.s32.totalorder %s862_s15, 0 }
  0x48   : > { %s553_s22 = sshll.u32 %s1060_s24, 4  ;;  %v883_v0 = vmov (!%p555_p12), -3.4028235e+38  }
  0x49   : > { %s1063_s29 = scalar_lea.vmem [#allocation9], %s553_s22  ;;  %s1065_s8 = scalar_lea.vmem [#allocation10], %s553_s22  ;;  %193 = vst [vmem:[#allocation2] sm:$0xff] (!%p555_p12), %v883_v0  ;;  %194 = vst [vmem:[#allocation2 + $0x8] sm:$0xff] (!%p555_p12), %v883_v0 }
  0x4a   : > { %192 = sbr.rel (%p555_p12) target bundleno = 81 (0x51), region = 32  ;;  %195 = vst [vmem:[#allocation2 + $0x10] sm:$0xff] (!%p555_p12), %v883_v0  ;;  %196 = vst [vmem:[#allocation2 + $0x18] sm:$0xff] (!%p555_p12), %v883_v0 }
  0x4b   : > { %197 = vst [vmem:[#allocation2 + $0x20] sm:$0xff] (!%p555_p12), %v883_v0  ;;  %198 = vst [vmem:[#allocation2 + $0x28] sm:$0xff] (!%p555_p12), %v883_v0 }
  0x4c   : > { %199 = vst [vmem:[#allocation2 + $0x30] sm:$0x3] (!%p555_p12), %v883_v0  ;;  %200 = vst [vmem:[#allocation2 + $0x38] sm:$0x3] (!%p555_p12), %v883_v0 }
  0x4d   : > { %201 = vst [vmem:[#allocation2 + $0x40] sm:$0x3] (!%p555_p12), %v883_v0  ;;  %202 = vst [vmem:[#allocation3] sm:$0x1] (!%p555_p12), %v883_v0 }
  0x4e   : > { %203 = vst [vmem:[#allocation3 + $0x11] sm:$0x1] (!%p555_p12), %v883_v0 }
  0x51 PF: > { %v224_v1 = vld [vmem:[#allocation2] sm:$0xfe]  ;;  %v225_v2 = vld [vmem:[#allocation2 + $0x18] sm:$0xff]  ;;  %s884_s28 = smov 1   ;;  %vm219_vm0 = vcmask 122880   ;;  %vm215_vm1 = vcmask 130049  }
  0x52   : > { %233 = vrot.lane.b32.xlu0 %v224_v1, %s884_s28  ;;  %237 = vrot.lane.b32.xlu1 %v225_v2, %s884_s28  ;;  %v205_v3 = vld [vmem:[%s163_s7 + $0x8] sm:$0xff]  ;;  %v204_v4 = vld [vmem:[%s163_s7] sm:$0xff]  ;;  %vm208_vm2 = vcmask 1040384   ;;  %vm217_vm3 = vcmask 130048   ;;  %s885_s27 = smov 127   ;;  %vm245_vm4 = vcmask 7168  }
  0x53   : > { %v226_v5 = vld [vmem:[#allocation2 + $0x30] sm:$0x1]  ;;  %v210_v6 = vrot.slane %v205_v3, 7  ;;  %v209_v7 = vrot.slane %v204_v4, 7  ;;  %v255_v11 = vld [vmem:[#allocation2 + $0x10] sm:$0xfe] }
  0x54   : > { %v256_v13 = vld [vmem:[#allocation2 + $0x28] sm:$0xff]  ;;  %v257_v14 = vld [vmem:[#allocation2 + $0x40] sm:$0x1]  ;;  %vm273_vm5 = vcmask 1039360   ;;  %v886_v57 = vmov (!%p555_p12), 0  }
  0x55   : > { %220 = vst.msk [vmem:[#allocation2 + $0x38] sm:$0x1] %vm219_vm0, %v210_v6  ;;  %v211_v8 = vsel %vm208_vm2, %v209_v7, %v210_v6  ;;  %324 = vst [vmem:[#allocation5] sm:$0xff] (!%p555_p12), %v886_v57 }
  0x56   : > { %216 = vst.msk [vmem:[#allocation2 + $0x8] sm:$0xfe] %vm215_vm1, %v209_v7  ;;  %241 = vrot.lane.b32.xlu0 %v226_v5, %s884_s28  ;;  %325 = vst [vmem:[#allocation5 + $0x8] sm:$0xff] (!%p555_p12), %v886_v57 }
  0x57   : > { %218 = vst.msk [vmem:[#allocation2 + $0x20] sm:$0xff] %vm217_vm3, %v211_v8 }
  0x5c   : > { %v1071_v9 = vld [vmem:[#allocation2 + $0x38] sm:$0x1] }
  0x5d   : > { %v221_v10 = vld [vmem:[#allocation2 + $0x8] sm:$0xfe]  ;;  %243 = vrot.lane.b32.xlu1 %v1071_v9, %s884_s28 }
  0x5e   : > { %235 = vrot.lane.b32.xlu0 %v221_v10, %s884_s28  ;;  %v222_v12 = vld [vmem:[#allocation2 + $0x20] sm:$0xff] }
  0x61   : > { %263 = vrot.lane.b32.xlu1 %v255_v11, %s885_s27 }
  0x62   : > { %261 = vrot.lane.b32.xlu0 %v221_v10, %s885_s27 }
  0x65   : > { %239 = vrot.lane.b32.xlu1 %v222_v12, %s884_s28 }
  0x66   : > { %265 = vrot.lane.b32.xlu0 %v222_v12, %s885_s27 }
  0x69   : > { %267 = vrot.lane.b32.xlu1 %v256_v13, %s885_s27 }
  0x6a   : > { %269 = vrot.lane.b32.xlu0 %v1071_v9, %s885_s27 }
  0x6d   : > { %271 = vrot.lane.b32.xlu1 %v257_v14, %s885_s27 }
  0xc4   : > { %v234_v15 = vpop.permute.xlu0 %233  ;;  %v238_v16 = vpop.permute.xlu1 %237 }
  0xc8   : > { %v242_v17 = vpop.permute.xlu0 %241 }
  0xcf   : > { %v244_v18 = vpop.permute.xlu1 %243 }
  0xd0   : > { %v236_v19 = vpop.permute.xlu0 %235  ;;  %v248_v31 = vsel %vm245_vm4, %v242_v17, %v244_v18 }
  0xd1   : > { %v246_v20 = vsel %vm245_vm4, %v234_v15, %v236_v19  ;;  %v254_v35 = vmax.f32 %v1071_v9, %v248_v31 }
  0xd2   : > { %v252_v21 = vmax.f32 %v221_v10, %v246_v20 }
  0xd3   : > { %v264_v22 = vpop.permute.xlu1 %263 }
  0xd4   : > { %v262_v23 = vpop.permute.xlu0 %261 }
  0xd5   : > { %v274_v24 = vsel %vm273_vm5, %v262_v23, %v264_v22 }
  0xd6   : > { %v280_v25 = vmax.f32 %v252_v21, %v274_v24 }
  0xd7   : > { %v240_v26 = vpop.permute.xlu1 %239 }
  0xd8   : > { %283 = vst [vmem:[#allocation3] sm:$0xfe] %v280_v25  ;;  %v266_v27 = vpop.permute.xlu0 %265  ;;  %v247_v28 = vsel %vm245_vm4, %v238_v16, %v240_v26 }
  0xd9   : > { %v253_v29 = vmax.f32 %v222_v12, %v247_v28 }
  0xdb   : > { %v268_v30 = vpop.permute.xlu1 %267 }
  0xdc   : > { %v275_v32 = vsel %vm273_vm5, %v266_v27, %v268_v30  ;;  %v270_v34 = vpop.permute.xlu0 %269 }
  0xdd   : > { %v281_v33 = vmax.f32 %v253_v29, %v275_v32 }
  0xdf   : > { %284 = vst [vmem:[#allocation3 + $0x8] sm:$0xff] %v281_v33  ;;  %v272_v36 = vpop.permute.xlu1 %271  ;;  %v286_v37 = vld [vmem:[#allocation3] sm:$0xff]  ;;  %v291_v41 = vrot.slane %v281_v33, 7 }
  0xe0   : > { %v276_v38 = vsel %vm273_vm5, %v270_v34, %v272_v36  ;;  %v290_v40 = vrot.slane %v286_v37, 7 }
  0xe1   : > { %v282_v39 = vmax.f32 %v254_v35, %v276_v38 }
  0xe2   : > { %v296_v43 = vmax.f32 %v280_v25, %v290_v40  ;;  %v292_v45 = vsel %vm208_vm2, %v290_v40, %v291_v41 }
  0xe3   : > { %285 = vst [vmem:[#allocation3 + $0x10] sm:$0x1] %v282_v39  ;;  %v298_v48 = vmax.f32 %v282_v39, %v291_v41  ;;  %v297_v50 = vmax.f32 %v281_v33, %v292_v45 }
  0xe6   : > { %v299_v42 = vld [vmem:[#allocation3 + $0x2] sm:$0xff] }
  0xe7   : > { %v303_v44 = vrot.slane %v299_v42, 7 }
  0xe9   : > { %v309_v46 = vmax.f32 %v296_v43, %v303_v44 }
  0xea   : > { %v300_v47 = vld [vmem:[#allocation3 + $0xa] sm:$0xff] }
  0xeb   : > { %vm312_vm6 = vcmp.eq.f32.partialorder %v309_v46, %v221_v10  ;;  %v304_v49 = vrot.slane %v300_v47, 7  ;;  %320 = sbr.rel (%p555_p12) target bundleno = 243 (0xf3), region = 36 }
  0xec   : > { %v315_v51 = vsel %vm312_vm6, %v221_v10, -3.4028235e+38 }
  0xed   : > { %v305_v52 = vsel %vm208_vm2, %v303_v44, %v304_v49  ;;  %v311_v53 = vmax.f32 %v298_v48, %v304_v49  ;;  %321 = vst [vmem:[#allocation4 - $0x1] sm:$0xfe] (!%p555_p12), %v315_v51 }
  0xee   : > { %v310_v54 = vmax.f32 %v297_v50, %v305_v52 }
  0xef   : > { %vm314_vm7 = vcmp.eq.f32.partialorder %v311_v53, %v1071_v9 }
  0xf0   : > { %vm313_vm8 = vcmp.eq.f32.partialorder %v310_v54, %v222_v12  ;;  %v317_v55 = vsel %vm314_vm7, %v1071_v9, -3.4028235e+38 }
  0xf1   : > { %v316_v56 = vsel %vm313_vm8, %v222_v12, -3.4028235e+38  ;;  %323 = vst [vmem:[#allocation4 + $0xf] sm:$0x1] (!%p555_p12), %v317_v55 }
  0xf2   : > { %322 = vst [vmem:[#allocation4 + $0x7] sm:$0xff] %v316_v56 }
  0xf3 PF: > { %p557_p7 = scmp.le.s32.totalorder %s862_s15, 0 }
  0xf4   : > { %v349_v60 = vld [vmem:[#allocation5] sm:$0xff] (!%p557_p7)  ;;  %v351_v63 = vstv (!%p557_p7), %s862_s15  ;;  %v350_v1 = vld [vmem:[#allocation5 + $0x8] sm:$0xff] (!%p557_p7) }
  0xf5   : > { %329 = sbr.rel (%p557_p7) target bundleno = 257 (0x101), region = 40  ;;  %v352_v0 = vrot.slane (!%p557_p7), %v349_v60, 7  ;;  %v353_v2 = vrot.slane (!%p557_p7), %v350_v1, 7 }
  0xf7   : > { %v354_v8 = vsel (!%p557_p7), %vm208_vm2, %v352_v0, %v353_v2 }
  0xf9   : > { %v330_v58 = vld [vmem:[#allocation4] sm:$0xff] (!%p557_p7)  ;;  %v331_v59 = vld [vmem:[#allocation4 + $0x8] sm:$0xff] (!%p557_p7) }
  0xfa   : > { %v334_v61 = vrot.slane (!%p557_p7), %v330_v58, 7  ;;  %v335_v62 = vrot.slane (!%p557_p7), %v331_v59, 7 }
  0xfc   : > { %vm340_vm9 = vcmp.gt.f32.partialorder %v315_v51, %v334_v61  ;;  %v336_v3 = vsel %vm208_vm2, %v334_v61, %v335_v62  ;;  %vm342_vm10 = vcmp.gt.f32.partialorder %v317_v55, %v335_v62 }
  0xfd   : > { %v343_v4 = vsel %vm340_vm9, %v315_v51, %v334_v61  ;;  %vm341_vm11 = vcmp.gt.f32.partialorder %v316_v56, %v336_v3  ;;  %v345_v5 = vsel %vm342_vm10, %v317_v55, %v335_v62  ;;  %v355_v6 = vsel %vm340_vm9, %v351_v63, %v352_v0 }
  0xfe   : > { %346 = vst [vmem:[#allocation4 - $0x1] sm:$0xfe] %v343_v4  ;;  %v344_v7 = vsel %vm341_vm11, %v316_v56, %v336_v3  ;;  %348 = vst [vmem:[#allocation4 + $0xf] sm:$0x1] %v345_v5  ;;  %v357_v9 = vsel %vm342_vm10, %v351_v63, %v353_v2  ;;  %v356_v10 = vsel %vm341_vm11, %v351_v63, %v354_v8 }
  0xff   : > { %358 = vst [vmem:[#allocation5 - $0x1] sm:$0xfe] %v355_v6  ;;  %347 = vst [vmem:[#allocation4 + $0x7] sm:$0xff] %v344_v7 }
 0x100   : > { %360 = vst [vmem:[#allocation5 + $0xf] sm:$0x1] %v357_v9  ;;  %359 = vst [vmem:[#allocation5 + $0x7] sm:$0xff] %v356_v10 }
 0x101 PF: > { %p558_p2 = scmp.ne.s32.totalorder %s862_s15, 3 }
 0x103   : > { %364 = sbr.rel (%p558_p2) target bundleno = 292 (0x124), region = 44 }
 0x106   : > { %v365_v11 = vld [vmem:[#allocation4] sm:$0xff] (!%p558_p2)  ;;  %v366_v12 = vld [vmem:[#allocation4 + $0x8] sm:$0xff] (!%p558_p2) }
 0x107   : > { %v385_v13 = vld [vmem:[#allocation5] sm:$0xff] (!%p558_p2)  ;;  %v559_v14 = vmul.f32 (!%p558_p2), -1.442695, %v365_v11  ;;  %v560_v15 = vmul.f32 (!%p558_p2), -1.442695, %v366_v12  ;;  %v386_v16 = vld [vmem:[#allocation5 + $0x8] sm:$0xff] (!%p558_p2) }
 0x108   : > { %387 = vst [vmem:[%s1065_s8] sm:$0xff] (!%p558_p2), %v385_v13  ;;  %388 = vst [vmem:[%s1065_s8 + $0x8] sm:$0xff] (!%p558_p2), %v386_v16  ;;  %vm379_vm12 = vcmp.eq.f32.partialorder (!%p558_p2), %v365_v11, -3.4028235e+38  ;;  %vm380_vm13 = vcmp.eq.f32.partialorder (!%p558_p2), %v366_v12, -3.4028235e+38 }
 0x109   : > { %686 = vpow2.f32 (!%p558_p2), %v559_v14 }
 0x10a   : > { %688 = vpow2.f32 %v560_v15 }
 0x113   : > { %v687_v17 = vpop.eup %686 }
 0x114   : > { %v689_v18 = vpop.eup %688  ;;  %v373_v19 = vadd.f32 1.0, %v687_v17 }
 0x115   : > { %v374_v20 = vadd.f32 1.0, %v689_v18 }
 0x116   : > { %690 = vrcp.f32 %v373_v19 }
 0x117   : > { %692 = vrcp.f32 %v374_v20 }
 0x120   : > { %v691_v21 = vpop.eup %690 }
 0x121   : > { %v693_v22 = vpop.eup %692  ;;  %v381_v23 = vsel %vm379_vm12, 0.0, %v691_v21 }
 0x122   : > { %383 = vst [vmem:[%s1063_s29] sm:$0xff] %v381_v23  ;;  %v382_v24 = vsel %vm380_vm13, 0.0, %v693_v22 }
 0x123   : > { %384 = vst [vmem:[%s1063_s29 + $0x8] sm:$0xff] %v382_v24 }
 0x124 PF: > { %s569_s15 = sshll.u32 %s866_s16, 8  ;;  %s408_s23 = sshll.u32 %s1063_s29, 4  ;;  %s1106_s23 = int_to_ptr.vmem [resolvable:$true] %s408_s23 }
 0x125   : > { %s1103_s12 = scalar_lea.hbm %s1210_s1, %s569_s15  ;;  %s390_s20 = scalar_lea.sflag [#allocation8], %s1060_s24 }
 0x126   : > { %s724_s25 = scalar_lea.vmem %s1106_s23, 256  ;;  %p1222_p0 = scmp.ne.s32.totalorder %s1219_s3, 0 }
 0x127   : > { %p725_p4 = scmp.ne.s32.totalorder %s1106_s23, %s724_s25  ;;  %s887_s30 = smov [#allocation9]  }
 0x128   : > { %s728_s7 = sshll.u32 %s887_s30, 4  ;;  %s729_s7 = int_to_ptr.vmem [resolvable:$false] %s728_s7 }
 0x129   : > { %p726_p1 = pnand %p725_p4, %p1222_p0  ;;  %s730_s22 = scalar_lea.vmem %s729_s7, 512 }
 0x12a   : > { %p731_p6 = scmp.lt.s32.totalorder %s1106_s23, %s729_s7  ;;  %p732_p9 = scmp.lt.s32.totalorder %s730_s22, %s724_s25 }
 0x12b   : > { %p727_p5 = pneg %p726_p1 }
 0x12c   : > { %p733_p10 = por %p732_p9, %p731_p6 }
 0x12e   : > { %p734_p11 = pnand %p733_p10, %p727_p5 }
 0x130   : > { %737 = shalt.err (!%p734_p11)
}
 0x131   : > { %s738_s29 = scalar_lea.hbm %s1103_s12, 256  ;;  %s742_s21 = scalar_lea.hbm %s1210_s1, 512 }
 0x132   : > { %p739_p3 = scmp.ne.s32.totalorder %s1103_s12, %s738_s29  ;;  %p743_p12 = scmp.lt.u32.totalorder %s1103_s12, %s1210_s1 }
 0x133   : > { %p744_p7 = scmp.lt.u32.totalorder %s742_s21, %s738_s29  ;;  %p746_p4 = scmp.lt.u32.totalorder %s738_s29, %s1103_s12 }
 0x134   : > { %p740_p8 = pnand %p739_p3, %p1222_p0 }
 0x135   : > { %p745_p2 = por %p744_p7, %p743_p12 }
 0x136   : > { %p741_p13 = pneg %p740_p8 }
 0x137   : > { %p747_p1 = por %p746_p4, %p745_p2 }
 0x139   : > { %p748_p5 = pnand %p747_p1, %p741_p13 }
 0x13b   : > { %751 = shalt.err (!%p748_p5)
}
 0x13c   : > { %s888_s25 = smov 128   ;;  %s889_s7 = smov 8  }
 0x13d   : > { %573 = dma.vmem_to_hbm [thread:$0]  (%p1222_p0), %s1106_s23, 256, %s1103_s12, %s390_s20, %s888_s25, %s888_s25, %s889_s7  }
 0x13e   : > { %s1140_s28 = scalar_lea.hbm %s1211_s2, %s569_s15  ;;  %s424_s27 = sshll.u32 %s1065_s8, 4  ;;  %s1143_s27 = int_to_ptr.vmem [resolvable:$true] %s424_s27 }
 0x13f   : > { %s395_s21 = scalar_lea.sflag [#allocation11], %s1060_s24  ;;  %s752_s26 = scalar_lea.vmem %s1143_s27, 256 }
 0x140   : > { %p753_p6 = scmp.ne.s32.totalorder %s1143_s27, %s752_s26  ;;  %s890_s30 = smov [#allocation10]  }
 0x141   : > { %s756_s12 = sshll.u32 %s890_s30, 4  ;;  %s757_s12 = int_to_ptr.vmem [resolvable:$false] %s756_s12 }
 0x142   : > { %p754_p9 = pnand %p753_p6, %p1222_p0  ;;  %s758_s16 = scalar_lea.vmem %s757_s12, 512 }
 0x143   : > { %p759_p11 = scmp.lt.s32.totalorder %s1143_s27, %s757_s12  ;;  %p760_p3 = scmp.lt.s32.totalorder %s758_s16, %s752_s26 }
 0x144   : > { %p755_p10 = pneg %p754_p9 }
 0x145   : > { %p761_p8 = por %p760_p3, %p759_p11 }
 0x147   : > { %p762_p13 = pnand %p761_p8, %p755_p10 }
 0x149   : > { %765 = shalt.err (!%p762_p13)
}
 0x14a   : > { %s766_s8 = scalar_lea.hbm %s1140_s28, 256  ;;  %s770_s20 = scalar_lea.hbm %s1211_s2, 512 }
 0x14b   : > { %p767_p12 = scmp.ne.s32.totalorder %s1140_s28, %s766_s8  ;;  %p771_p4 = scmp.lt.u32.totalorder %s1140_s28, %s1211_s2 }
 0x14c   : > { %p772_p1 = scmp.lt.u32.totalorder %s770_s20, %s766_s8  ;;  %p774_p6 = scmp.lt.u32.totalorder %s766_s8, %s1140_s28 }
 0x14d   : > { %p768_p7 = pnand %p767_p12, %p1222_p0 }
 0x14e   : > { %p773_p5 = por %p772_p1, %p771_p4 }
 0x14f   : > { %p769_p2 = pneg %p768_p7 }
 0x150   : > { %p775_p9 = por %p774_p6, %p773_p5 }
 0x152   : > { %p776_p10 = pnand %p775_p9, %p769_p2 }
 0x154   : > { %779 = shalt.err (!%p776_p10)
}
 0x155   : > { %574 = dma.vmem_to_hbm [thread:$0]  (%p1222_p0), %s1143_s27, 256, %s1140_s28, %s395_s21, %s888_s25, %s888_s25, %s889_s7  }
 0x156 PF: > { %p589_p11 = scmp.ge.s32.totalorder %s878_s19, 2  ;;  %s439_s26 = sand.u32 1, %s838_s9  }
 0x157   : > { %p1223_p3 = scmp.ne.s32.totalorder %s1220_s6, 0  ;;  %s440_s30 = scalar_lea.sflag [#allocation8], %s439_s26 }
 0x159   : > { %p582_p8 = pnand %p589_p11, %p1223_p3 }
 0x15b   : > { %829 = dma.done.wait (!%p582_p8), %s440_s30, 256  }
 0x15c   : > { %831 = vsyncadd (!%p582_p8), %s440_s30, 4294967040  ;;  %s449_s3 = scalar_lea.sflag [#allocation11], %s439_s26 }
 0x15d   : > { %833 = dma.done.wait (!%p582_p8), %s449_s3, 256  }
 0x15e   : > { %835 = vsyncadd (!%p582_p8), %s449_s3, 4294967040  ;;  %s22_s19 = sadd.s32 1, %s878_s19   ;;  %s1224_s24 = sld [smem:[#allocation15_spill]] }
 0x15f   : > { %p19_p13 = scmp.ge.s32.totalorder %s22_s19, 10   ;;  %s1225_s6 = sld [smem:[#allocation16_spill]] }
 0x160   : > { %s1226_s9 = smov %s842_s10  ;;  %s1227_s10 = smov %s846_s11 }
 0x161   : > { %s1228_s11 = smov %s993_s4  ;;  %s1229_s12 = smov %s854_s13 }
 0x162   : > { %s1230_s13 = smov %s858_s14  ;;  %s1231_s14 = smov %s996_s5 }
 0x163   : > { %s1232_s15 = smov %s870_s17  ;;  %s1233_s16 = smov %s874_s18 }
 0x164   : > { %s1234_s17 = smov %s1224_s24  ;;  %21 = sbr.rel (!%p19_p13) target bundleno = 11 (0xb), region = 102 }
 0x165   : > { %s1235_s18 = smov %s1225_s6 }
 0x16b   :  { %454 = vsyncpa [#allocation7], 1 }
 0x16c   :  { %456 = vsyncpa [#allocation7 + $0x1], 1 }
 0x16d   :  { %457 = vsyncpa [#allocation8], 1 }
 0x16e   :  { %459 = vsyncpa [#allocation8 + $0x1], 1 }
 0x16f   :  { %460 = vsyncpa [#allocation11], 1 }
 0x170   :  { %462 = vsyncpa [#allocation11 + $0x1], 1 }

</bundles_post_ra>
